<compile_context>
chip_gen: v5e
topology: v5e:2x2
jax: 0.10.0
libtpu: 0.0.40
codegen_flags: <defaults>
</compile_context>

<pallas_src>
import functools
import inspect

import jax
import jax.numpy as jnp
from jax.experimental import pallas as pl
from jax.experimental.pallas import tpu as pltpu


try:
    _HAS_BUFFERED = hasattr(pl, "Buffered") and (
        "pipeline_mode" in inspect.signature(pl.BlockSpec).parameters)
except (TypeError, ValueError):  # pragma: no cover - defensive
    _HAS_BUFFERED = False


def _phi_jac_kernel(xt_ref, m_ref, b1_ref, w2_ref, out_ref, *, d, d_pad, use_bf16):
    """Fused RHS on one lane-block of the batch (batch lives on the lane axis).

    xt  : (D, blk)          state columns
    M   : (D_pad + H, D)    rows [0:D] = A, rows [D_pad:] = W1 @ A
    b1  : (H, 1)
    W2  : (D, H)
    out : (D, blk)          out = dx + W2 ((1 - tanh(W1 dx + b1)^2) ⊙ (W1 dx))
    """
    xt = xt_ref[...]                                   # (D, blk) f32
    m = m_ref[...]                                     # (D_pad+H, D)
    w2 = w2_ref[...]                                   # (D, H)
    xt_mm = xt.astype(jnp.bfloat16) if use_bf16 else xt

    # One MXU pass yields both dx = A x and W1·dx = (W1 A) x.  Row slices are
    # sublane-aligned because the A-block of M was padded to a multiple of 8.
    fused = jnp.dot(m, xt_mm, preferred_element_type=jnp.float32)   # (D_pad+H, blk)
    dxt = fused[:d, :]                                              # (D, blk)
    w1dx = fused[d_pad:, :]                                         # (H, blk)

    th = jnp.tanh(w1dx + b1_ref[...])                               # EUP, (H, blk)
    g = (1.0 - th * th) * w1dx                                      # (H, blk)
    g_mm = g.astype(jnp.bfloat16) if use_bf16 else g

    out = dxt + jnp.dot(w2, g_mm, preferred_element_type=jnp.float32)  # (D, blk)
    out_ref[...] = out.astype(out_ref.dtype)


def prepare_params(A, W1, b1, W2, use_bf16=None):
    """One-time parameter prep (hoisted out of the per-call hot path).

    Builds M = [A ; zero-pad ; W1 @ A] so the kernel needs a single matmul
    against the state to obtain both dx and W1·dx (shorter MXU chain).
    """
    A = jnp.asarray(A, jnp.float32)
    W1 = jnp.asarray(W1, jnp.float32)
    b1 = jnp.asarray(b1, jnp.float32)
    W2 = jnp.asarray(W2, jnp.float32)
    D = A.shape[0]
    H = W1.shape[0]
    if use_bf16 is None:
        # bf16 matmul operands only pay off once the MXU is throughput-bound.
        use_bf16 = D >= 128 and H >= 128
    d_pad = ((D + 7) // 8) * 8          # sublane-align the dx row block of M
    M = jnp.zeros((d_pad + H, D), jnp.float32)
    M = M.at[:D, :].set(A).at[d_pad:, :].set(W1 @ A)
    mm_dtype = jnp.bfloat16 if use_bf16 else jnp.float32
    return (M.astype(mm_dtype),          # (D_pad + H, D)
            b1.reshape(-1, 1),           # (H, 1), always f32 (VPU/EUP math)
            W2.astype(mm_dtype))         # (D, H)


def _pick_block(b_pad, d):
    """Largest 128-multiple divisor of b_pad under a VMEM budget; force >= 2
    lane blocks once b_pad >= 256 so the parallel grid axis can split across
    the two TensorCores on v7x (negligible extra step cost on 1-TC chips)."""
    stream_budget = 8 * 1024 * 1024                      # streamed x/out buffers
    cap = max(128, (stream_budget // (16 * d)) // 128 * 128)
    if b_pad >= 256:
        cap = min(cap, max(128, (b_pad // 2) // 128 * 128))
    n = b_pad // 128
    blk = 128
    for k in range(1, n + 1):
        if n % k == 0 and 128 * k <= cap:
            blk = 128 * k
    return blk


def _resident_spec(shape):
    """Spec for a weight that never changes across grid steps: constant
    index_map keeps it VMEM-resident; single buffer halves its VMEM footprint
    (no point double-buffering a block that is fetched exactly once)."""
    index_map = lambda i: (0,) * len(shape)
    if _HAS_BUFFERED:
        return pl.BlockSpec(shape, index_map, pipeline_mode=pl.Buffered(1))
    return pl.BlockSpec(shape, index_map)


def phi_jac_forward_cols(xt, params):
    """Column-layout core: xt is (D, B_pad) with B_pad a multiple of 128;
    returns out^T of the same shape.  ODE loops should call this directly
    (state kept lane-major) so no per-step transpose/pad plumbing is needed."""
    M, b1, W2 = params
    D, H = W2.shape
    d_pad = M.shape[0] - H
    use_bf16 = M.dtype == jnp.bfloat16
    b_pad = xt.shape[1]
    assert xt.shape[0] == D and b_pad % 128 == 0, xt.shape

    blk = _pick_block(b_pad, D)
    nb = b_pad // blk

    kernel = functools.partial(_phi_jac_kernel, d=D, d_pad=d_pad, use_bf16=use_bf16)

    flops = 2 * b_pad * ((d_pad + H) * D + D * H) + 6 * b_pad * H + b_pad * D
    bytes_accessed = (4 * 2 * D * b_pad
                      + M.size * M.dtype.itemsize
                      + 4 * H
                      + W2.size * W2.dtype.itemsize)

    return pl.pallas_call(
        kernel,
        out_shape=jax.ShapeDtypeStruct((D, b_pad), jnp.float32),
        grid=(nb,),
        in_specs=[
            pl.BlockSpec((D, blk), lambda i: (0, i)),   # state block (lane-dense)
            _resident_spec((d_pad + H, D)),             # M = [A ; W1@A]  (resident)
            _resident_spec((H, 1)),                     # b1              (resident)
            _resident_spec((D, H)),                     # W2              (resident)
        ],
        out_specs=pl.BlockSpec((D, blk), lambda i: (0, i)),
        compiler_params=pltpu.CompilerParams(
            dimension_semantics=("parallel",),          # 2-TC split on v7x when nb >= 2
            vmem_limit_bytes=32 * 1024 * 1024),
        cost_estimate=pl.CostEstimate(
            flops=flops, transcendentals=b_pad * H,
            bytes_accessed=bytes_accessed),
    )(xt, M, b1, W2)


def phi_jac_forward(t, x, params):
    """Pallas implementation of PhiJacSystem.forward(t, x).

    `t` is accepted for interface fidelity but unused: the synthetic base
    system is autonomous (the torch base class leaves f(t, x) to subclasses).
    """
    del t
    x = jnp.asarray(x, jnp.float32)
    if x.ndim == 1:                                 # torch: x = x.unsqueeze(0)
        x = x[None, :]
    B, D = x.shape

    # Batch on lanes: pad B to a multiple of 128 and transpose (pure layout
    # plumbing, fused by jit; jnp.pad avoids the zeros+scatter round trip).
    b_pad = max(128, ((B + 127) // 128) * 128)
    xt = x.T
    if b_pad != B:
        xt = jnp.pad(xt, ((0, 0), (0, b_pad - B)))

    out_t = phi_jac_forward_cols(xt, params)
    out = out_t[:, :B].T                            # back to (B, D)
    if out.shape[0] == 1:                           # torch: .squeeze(0)
        out = out[0]
    return out


phi_jac_forward_jit = jax.jit(phi_jac_forward)
phi_jac_forward_cols_jit = jax.jit(phi_jac_forward_cols)


if __name__ == "__main__":
    key = jax.random.PRNGKey(0)
    B, D, H = 256, 8, 32
    kx, kA, kW1, kb1, kW2 = jax.random.split(key, 5)

    # Deterministic synthetic state + parameters.
    x = jax.random.normal(kx, (B, D), jnp.float32)
    A = jax.random.normal(kA, (D, D), jnp.float32) * 0.5    # base_system linear map
    W1 = jax.random.normal(kW1, (H, D), jnp.float32) * 0.3  # diffeomorphism layer 1
    b1 = jax.random.normal(kb1, (H,), jnp.float32) * 0.1
    W2 = jax.random.normal(kW2, (D, H), jnp.float32) * 0.3  # diffeomorphism layer 2
    t = jnp.float32(0.0)

    params = prepare_params(A, W1, b1, W2)                  # one-time prep
    out = jax.block_until_ready(phi_jac_forward_jit(t, x, params))

    # Plain-JAX reference that literally materializes the batched Jacobian and
    # does matmul(J, dx[..., None]).squeeze(-1), mirroring the torch code.
    dx_ref = x @ A.T
    g_ref = 1.0 - jnp.tanh(dx_ref @ W1.T + b1[None, :]) ** 2
    J_ref = jnp.eye(D, dtype=jnp.float32)[None] + jnp.einsum("dh,bh,he->bde", W2, g_ref, W1)
    ref = jnp.einsum("bde,be->bd", J_ref, dx_ref)

    assert out.shape == ref.shape, (out.shape, ref.shape)
    err = float(jnp.max(jnp.abs(out - ref)))
    assert jnp.allclose(out, ref, atol=1e-3, rtol=1e-3), f"max abs err {err}"

    # 1-D state path (torch unsqueeze(0)/squeeze(0) semantics).
    out1 = jax.block_until_ready(phi_jac_forward_jit(t, x[0], params))
    assert out1.shape == (D,), out1.shape
    assert jnp.allclose(out1, ref[0], atol=1e-3, rtol=1e-3)

    # Column-layout entry point (what an ODE loop should keep calling).
    out_cols = jax.block_until_ready(phi_jac_forward_cols_jit(x.T, params))
    assert jnp.allclose(out_cols.T, ref, atol=1e-3, rtol=1e-3)

    print("KERNEL_OK")
</pallas_src>

<mosaic_0001>
module attributes {stable_mosaic.version = 11 : i64} {
  func.func @_phi_jac_kernel(%arg0: i32, %arg1: memref<8x128xf32, #tpu.memory_space<vmem>>, %arg2: memref<40x8xf32, #tpu.memory_space<vmem>>, %arg3: memref<32x1xf32, #tpu.memory_space<vmem>>, %arg4: memref<8x32xf32, #tpu.memory_space<vmem>>, %arg5: memref<8x128xf32, #tpu.memory_space<vmem>>) attributes {dimension_semantics = [#tpu.dimension_semantics<parallel>], iteration_bounds = array<i64: 2>, scalar_prefetch = 0 : i64, scratch_operands = 0 : i64, tpu.core_type = #tpu.core_type<tc>, window_params = [{transform_indices = @transform_0, window_bounds = array<i64: 8, 128>}, {pipeline_mode = #tpu.pipeline_mode<synchronous>, transform_indices = @transform_1, window_bounds = array<i64: 40, 8>}, {pipeline_mode = #tpu.pipeline_mode<synchronous>, transform_indices = @transform_2, window_bounds = array<i64: 32, 1>}, {pipeline_mode = #tpu.pipeline_mode<synchronous>, transform_indices = @transform_3, window_bounds = array<i64: 8, 32>}, {transform_indices = @transform_4, window_bounds = array<i64: 8, 128>}]} {
    %c0 = arith.constant 0 : index
    %c0_0 = arith.constant 0 : index
    %0 = vector.load %arg1[%c0, %c0_0] : memref<8x128xf32, #tpu.memory_space<vmem>>, vector<8x128xf32>
    %c0_1 = arith.constant 0 : index
    %c0_2 = arith.constant 0 : index
    %1 = vector.load %arg2[%c0_1, %c0_2] : memref<40x8xf32, #tpu.memory_space<vmem>>, vector<40x8xf32>
    %c0_3 = arith.constant 0 : index
    %c0_4 = arith.constant 0 : index
    %2 = vector.load %arg4[%c0_3, %c0_4] : memref<8x32xf32, #tpu.memory_space<vmem>>, vector<8x32xf32>
    %cst = arith.constant dense<0.000000e+00> : vector<40x128xf32>
    %3 = tpu.matmul %1, %0, %cst {dimension_numbers = #tpu.dot_dimension_numbers<[1], [0], [0], [1], [0, 0, 1, 1], [], []>} : vector<40x8xf32>, vector<8x128xf32>, vector<40x128xf32> -> vector<40x128xf32>
    %4 = vector.extract_strided_slice %3 {offsets = [0, 0], sizes = [8, 128], strides = [1, 1]} : vector<40x128xf32> to vector<8x128xf32>
    %5 = vector.extract_strided_slice %3 {offsets = [8, 0], sizes = [32, 128], strides = [1, 1]} : vector<40x128xf32> to vector<32x128xf32>
    %c0_5 = arith.constant 0 : index
    %c0_6 = arith.constant 0 : index
    %6 = vector.load %arg3[%c0_5, %c0_6] : memref<32x1xf32, #tpu.memory_space<vmem>>, vector<32x1xf32>
    %7 = vector.broadcast %6 : vector<32x1xf32> to vector<32x128xf32>
    %8 = arith.addf %5, %7 : vector<32x128xf32>
    %9 = math.tanh %8 : vector<32x128xf32>
    %10 = arith.mulf %9, %9 : vector<32x128xf32>
    %cst_7 = arith.constant 1.000000e+00 : f32
    %11 = vector.broadcast %cst_7 : f32 to vector<32x128xf32>
    %12 = arith.subf %11, %10 : vector<32x128xf32>
    %13 = arith.mulf %12, %5 : vector<32x128xf32>
    %cst_8 = arith.constant dense<0.000000e+00> : vector<8x128xf32>
    %14 = tpu.matmul %2, %13, %cst_8 {dimension_numbers = #tpu.dot_dimension_numbers<[1], [0], [0], [1], [0, 0, 1, 1], [], []>} : vector<8x32xf32>, vector<32x128xf32>, vector<8x128xf32> -> vector<8x128xf32>
    %15 = arith.addf %4, %14 : vector<8x128xf32>
    %c0_9 = arith.constant 0 : index
    %c0_10 = arith.constant 0 : index
    %16 = vector.load %arg5[%c0_9, %c0_10] : memref<8x128xf32, #tpu.memory_space<vmem>>, vector<8x128xf32>
    tpu.vector_store %arg5[%c0_9, %c0_10], %15 {strides = array<i32>} : memref<8x128xf32, #tpu.memory_space<vmem>>, vector<8x128xf32>,
    return
  }
  func.func @transform_0(%arg0: i32) -> (i32, i32) {
    %c0_i32 = arith.constant 0 : i32
    %c0_i32_0 = arith.constant 0 : i32
    return %c0_i32, %arg0 : i32, i32
  }
  func.func @transform_1(%arg0: i32) -> (i32, i32) {
    %c0_i32 = arith.constant 0 : i32
    %c0_i32_0 = arith.constant 0 : i32
    %c0_i32_1 = arith.constant 0 : i32
    return %c0_i32, %c0_i32_0 : i32, i32
  }
  func.func @transform_2(%arg0: i32) -> (i32, i32) {
    %c0_i32 = arith.constant 0 : i32
    %c0_i32_0 = arith.constant 0 : i32
    %c0_i32_1 = arith.constant 0 : i32
    return %c0_i32, %c0_i32_0 : i32, i32
  }
  func.func @transform_3(%arg0: i32) -> (i32, i32) {
    %c0_i32 = arith.constant 0 : i32
    %c0_i32_0 = arith.constant 0 : i32
    %c0_i32_1 = arith.constant 0 : i32
    return %c0_i32, %c0_i32_0 : i32, i32
  }
  func.func @transform_4(%arg0: i32) -> (i32, i32) {
    %c0_i32 = arith.constant 0 : i32
    %c0_i32_0 = arith.constant 0 : i32
    return %c0_i32, %arg0 : i32, i32
  }
}

</mosaic_0001>

<bundles_post_ra>
// kernel: phi_jac_forward.1
= control target key start
LH: loop header
LB: loop body
LE: loop exit
PB: predicated region body
PF: predicated region fallthrough
CT: control target
= control target key end

     0   :  { %9 = vsyncpa [#allocation3], 0  ;;  %s671_s0 = inlined_call_operand.vmem [shape: f32[8,256], index: 0, kind: input, shape index: {}]   ;;  %s672_s1 = inlined_call_operand.vmem [shape: f32[40,8], index: 1, kind: input, shape index: {}]   ;;  %s673_s2 = inlined_call_operand.vmem [shape: f32[32,1], index: 2, kind: input, shape index: {}]   ;;  %s674_s3 = inlined_call_operand.vmem [shape: f32[8,32], index: 3, kind: input, shape index: {}]   ;;  %s675_s4 = inlined_call_operand.hbm [shape: f32[8,256], index: 4, kind: output, shape index: {}]  }
   0x1   :  { %11 = vsyncpa [#allocation3 + $0x1], 0  ;;  %s551_s15 = smov 0   ;;  %s553_s16 = smov 0  }
   0x2   :  { %s555_s17 = smov 0   ;;  %s557_s18 = smov 0  }
   0x3 LB: > { %s572_s19 = sadd.s32 4294967295, %s523_s18   ;;  %s393_s20 = sadd.s32 4294967294, %s523_s18   ;;  %s523_s18 = sphi %s557_s18, %s681_s18   ;;  %s519_s17 = sphi %s555_s17, %s680_s17   ;;  %s515_s16 = sphi %s553_s16, %s679_s16   ;;  %s511_s15 = sphi %s551_s15, %s678_s15  }
   0x4   : > { %s576_s21 = sadd.s32 1, %s523_s18   ;;  %s113_s22 = sadd.s32 1, %s519_s17 }
   0x5   : > { %s110_s23 = ssub.s32 %s523_s18, %s576_s21  ;;  %p123_p0 = scmp.ne.s32.totalorder %s519_s17, %s515_s16 }
   0x6   : > { %p111_p1 = scmp.eq.s32.totalorder %s110_s23, 0  ;;  %p124_p2 = scmp.eq.s32.totalorder %s572_s19, 1 }
   0x7   : > { %p129_p3 = scmp.ne.s32.totalorder %s515_s16, %s511_s15  ;;  %p130_p4 = scmp.eq.s32.totalorder %s393_s20, 1 }
   0x8   : > { %s587_s24 = scalar_select %p111_p1, %s519_s17, %s113_s22  }
   0x9   : > { %p589_p5 = por %p124_p2, %p123_p0  ;;  %p593_p6 = por %p130_p4, %p129_p3 }
   0xa   : > { %p396_p7 = scmp.ge.s32.totalorder %s523_s18, 1  ;;  %p164_p8 = scmp.lt.s32.totalorder %s523_s18, 3 }
   0xc   : > { %p165_p9 = pnand %p396_p7, %p164_p8 }
   0xd   : > { %p189_p10 = scmp.lt.s32.totalorder (!%p165_p9), %s572_s19, 1  ;;  %s406_s11 = sshll.u32 (!%p165_p9), %s572_s19, 3 }
   0xe   : > { %168 = sbr.rel (%p165_p9) target bundleno = 319 (0x13f), region = 36  ;;  %s329_s14 = scalar_lea.hbm (!%p165_p9), %s675_s4, %s406_s11 }
   0xf   : > { %s333_s23 = sshll.u32 (!%p165_p9), %s329_s14, 4  ;;  %s481_s5 = scalar_lea.hbm (!%p165_p9), %s675_s4, 16  ;;  %s334_s23 = int_to_ptr.hbm [resolvable:$true] %s333_s23 }
  0x10   : > { %s475_s28 = sshra.s32 (!%p165_p9), %s334_s23, 4  ;;  %s476_s28 = int_to_ptr.hbm [resolvable:$true] %s475_s28 }
  0x11   : > { %p482_p0 = scmp.lt.s32.totalorder (!%p165_p9), %s476_s28, %s675_s4 }
  0x13   : > { %v525_v0 = vmov 0   ;;  %v251_v1 = vld [vmem:[%s673_s2 + $0x18] sm:$0xff]  ;;  %s190_s29 = scalar_select %p189_p10, %s572_s19, 1  ;;  %v249_v2 = vld [vmem:[%s673_s2 + $0x8] sm:$0xff]  ;;  %v194_v3 = vld [vmem:[%s672_s1] sm:$0xff]  ;;  %vm200_vm0 = vcmask 64512  }
  0x14   : > { %451 = vset.pattern.permute.xlu0 %v525_v0  ;;  %452 = vset.pattern.permute.xlu1 %v525_v0  ;;  %v196_v5 = vld [vmem:[%s672_s1 + $0x10] sm:$0xff]  ;;  %v197_v6 = vld [vmem:[%s672_s1 + $0x18] sm:$0xff]  ;;  %v248_v8 = vld [vmem:[%s673_s2] sm:$0xff]  ;;  %vm292_vm1 = vcmask 261120  }
  0x15   : > { %269 = vperm.xlu0 %451, %v251_v1   ;;  %259 = vperm.xlu1 %452, %v249_v2   ;;  %s398_s6 = sshll.u32 %s190_s29, 3  ;;  %v250_v7 = vld [vmem:[%s673_s2 + $0x10] sm:$0xff]  ;;  %v195_v9 = vld [vmem:[%s672_s1 + $0x8] sm:$0xff]  ;;  %v198_v10 = vld [vmem:[%s672_s1 + $0x20] sm:$0xff]  ;;  %s477_s29 = scalar_lea.hbm %s476_s28, 8 }
  0x16   : > { %s192_s9 = scalar_lea.vmem %s671_s0, %s398_s6  ;;  %v199_v40 = vld [vmem:[%s674_s3] sm:$0xff]  ;;  %p478_p11 = scmp.ne.s32.totalorder %s476_s28, %s477_s29 }
  0x17   : > { %v193_v4 = vld [vmem:[%s192_s9] sm:$0xff]  ;;  %s186_s9 = sand.u32 1, %s515_s16   ;;  %p483_p1 = scmp.lt.s32.totalorder %s481_s5, %s477_s29 }
  0x18   : > { %231 = vmatpush.msra.mxu0 %v193_v4  ;;  %409 = vmatpush.msra.mxu2 %v193_v4  ;;  %s397_s10 = sshll.u32 %s186_s9, 3  ;;  %s319_s27 = scalar_lea.sflag [#allocation3], %s186_s9 }
  0x19   : > { %410 = vmatpush.msra.mxu3 %v193_v4  ;;  %399 = vmatmul.msk.f32.vlgmr.msra.gmra.mxu0 %vm200_vm0, %v194_v3  ;;  %s188_s20 = scalar_lea.vmem [#allocation2], %s397_s10  ;;  %p479_p12 = pnand %p478_p11, %p589_p5 }
  0x1a   : > { %401 = vmatmul.msk.f32.vlgmr.msra.gmra.mxu2 %vm200_vm0, %v196_v5  ;;  %402 = vmatmul.msk.f32.vlgmr.msra.gmra.mxu3 %vm200_vm0, %v197_v6  ;;  %s331_s22 = sshll.u32 %s188_s20, 4  ;;  %p484_p2 = por %p483_p1, %p482_p0  ;;  %s332_s22 = int_to_ptr.vmem [resolvable:$true] %s331_s22 }
  0x1b   : > { %p480_p13 = pneg %p479_p12 }
  0x1d   : > { %264 = vperm.xlu0 %451, %v250_v7   ;;  %254 = vperm.xlu1 %452, %v248_v8   ;;  %p485_p3 = pnand %p484_p2, %p480_p13 }
  0x21   : > { %400 = vmatmul.msk.f32.gmra.mxu0 %vm200_vm0, %v195_v9 }
  0x22   : > { %403 = vmatmul.msk.f32.gmra.mxu3 %vm200_vm0, %v198_v10 }
  0x87   : > { %v270_v11 = vpop.permute.xlu0 %269  ;;  %v260_v12 = vpop.permute.xlu1 %259 }
  0x8f   : > { %v265_v14 = vpop.permute.xlu0 %264  ;;  %v255_v18 = vpop.permute.xlu1 %254 }
  0x96   : > { %v233_v13 = vpop.f32.mrf.mxu0 }
  0x9d   : > { %v242_v15 = vpop.f32.mrf.mxu3  ;;  %v239_v16 = vpop.f32.mrf.mxu2 }
  0x9e   : > { %v274_v17 = vadd.f32 %v265_v14, %v242_v15  ;;  %v236_v19 = vpop.f32.mrf.mxu0  ;;  %v273_v20 = vadd.f32 %v260_v12, %v239_v16 }
  0x9f   : > { %v272_v21 = vadd.f32 %v255_v18, %v236_v19 }
  0xa0   : > { %453 = vtanh.f32 %v274_v17 }
  0xa1   : > { %455 = vtanh.f32 %v273_v20 }
  0xa2   : > { %457 = vtanh.f32 %v272_v21 }
  0xa5   : > { %v245_v22 = vpop.f32.mrf.mxu3 }
  0xa6   : > { %v275_v23 = vadd.f32 %v270_v11, %v245_v22  ;;  %v454_v24 = vpop.eup %453 }
  0xa7   : > { %v456_v25 = vpop.eup %455  ;;  %v282_v27 = vmul.f32 %v454_v24, %v454_v24 }
  0xa8   : > { %459 = vtanh.f32 %v275_v23  ;;  %v458_v26 = vpop.eup %457  ;;  %v281_v29 = vmul.f32 %v456_v25, %v456_v25 }
  0xa9   : > { %v280_v31 = vmul.f32 %v458_v26, %v458_v26  ;;  %v286_v33 = vsub.f32 1.0, %v282_v27 }
  0xaa   : > { %v285_v34 = vsub.f32 1.0, %v281_v29 }
  0xab   : > { %v284_v36 = vsub.f32 1.0, %v280_v31  ;;  %v290_v37 = vmul.f32 %v286_v33, %v242_v15 }
  0xac   : > { %v289_v38 = vmul.f32 %v285_v34, %v239_v16 }
  0xad   : > { %v288_v39 = vmul.f32 %v284_v36, %v236_v19 }
  0xae   : > { %v460_v28 = vpop.eup %459 }
  0xaf   : > { %v283_v30 = vmul.f32 %v460_v28, %v460_v28 }
  0xb1   : > { %v287_v32 = vsub.f32 1.0, %v283_v30 }
  0xb3   : > { %v291_v35 = vmul.f32 %v287_v32, %v245_v22 }
  0xb5   : > { %308 = vmatpush.msra.mxu1 %v291_v35 }
  0xb7   : > { %309 = vmatpush.msra.mxu1 %v290_v37 }
  0xb9   : > { %310 = vmatpush.msra.mxu1 %v289_v38 }
  0xbb   : > { %311 = vmatpush.msra.mxu1 %v288_v39 }
  0xbc   : > { %404 = vmatmul.msk.f32.vlgmr.msra.gmra.mxu1 %vm292_vm1, %v199_v40 }
 0x139   : > { %v313_v41 = vpop.f32.mrf.mxu1 }
 0x13a   : > { %v316_v42 = vadd.f32 %v313_v41, %v233_v13 }
 0x13c   : > { %317 = vst [vmem:[%s188_s20] sm:$0xff] %v316_v42 }
 0x13d   : > { %488 = shalt.err (!%p485_p3)
}
 0x13e   : > { %411 = dma.vmem_to_hbm [thread:$0]  (%p589_p5), %s332_s22, 128, %s334_s23, %s319_s27  }
 0x13f PF: > { %p417_p4 = scmp.ge.s32.totalorder %s523_s18, 2  ;;  %s345_s8 = sand.u32 1, %s511_s15  }
 0x140   : > { %s346_s9 = scalar_lea.sflag [#allocation3], %s345_s8 }
 0x141   : > { %p414_p7 = pnand %p417_p4, %p593_p6 }
 0x143   : > { %p415_p8 = pneg %p414_p7 }
 0x145   : > { %506 = dma.done.wait (%p415_p8), %s346_s9, 128  }
 0x146   : > { %508 = vsyncadd (%p415_p8), %s346_s9, 4294967168  ;;  %p14_p9 = scmp.ge.s32.totalorder %s576_s21, 4   ;;  %s678_s15 = smov %s515_s16 }
 0x147   : > { %s679_s16 = smov %s519_s17  ;;  %s680_s17 = smov %s587_s24 }
 0x148   : > { %s681_s18 = smov %s576_s21  ;;  %16 = sbr.rel (!%p14_p9) target bundleno = 3 (0x3), region = 71 }
 0x14d   :  { %352 = vsyncpa [#allocation3], 1 }
 0x14e   :  { %354 = vsyncpa [#allocation3 + $0x1], 1 }

</bundles_post_ra>
